<compile_context>
chip_gen: v7x
topology: tpu7x:2x2x1
jax: 0.10.0
libtpu: 0.0.40
codegen_flags: <defaults>
</compile_context>

<pallas_src>
import math

import jax
import jax.numpy as jnp
from jax import lax
from jax.experimental import pallas as pl
from jax.experimental.pallas import tpu as pltpu


def _decode_kernel(x_ref, w_ref, eps_ref, out_ref):
    """Fused decode: 2 MXU matmuls (means / stds halves) + softplus + sample."""
    output_dim = out_ref.shape[-1]
    x = x_ref[...]  # (rows, latent_dim) in native dtype (f32 or bf16)

    # Static column slices of the pre-transposed (K, 2N) weight ref: each dot's
    # result IS means / stds_raw directly — no post-matmul lane slicing.
    means = lax.dot_general(
        x, w_ref[:, :output_dim],
        dimension_numbers=(((1,), (0,)), ((), ())),
        preferred_element_type=jnp.float32,
    )
    stds_raw = lax.dot_general(
        x, w_ref[:, output_dim:],
        dimension_numbers=(((1,), (0,)), ((), ())),
        preferred_element_type=jnp.float32,
    )

    # Numerically-stable softplus (== torch.nn.functional.softplus), f32 EUP path.
    stds = jnp.maximum(stds_raw, 0.0) + jnp.log1p(jnp.exp(-jnp.abs(stds_raw)))

    out_ref[...] = (eps_ref[...].astype(jnp.float32) * stds + means).astype(out_ref.dtype)


def decoding_network_forward(latent_output, weight_t, eps, *,
                             out_dtype=jnp.float32, row_tile=None):
    """
    Args:
      latent_output: (..., latent_dim)  — leading dims (tasks, n_way, ...) are
                     independent rows and are flattened/batched into one call.
      weight_t:      (latent_dim, 2*output_dim) — nn.Linear weight stored
                     pre-transposed (one-time parameter re-layout).
      eps:           (..., output_dim) standard-normal reparameterization noise.
      out_dtype:     output dtype (default f32, matching the PyTorch module).
      row_tile:      rows per grid step (default: one block if M<=256, else 256).
    Returns:
      (..., output_dim) sample  ==  eps * softplus(stds_raw) + means.
    """
    lead = latent_output.shape[:-1]
    latent_dim = latent_output.shape[-1]
    k, two_d = weight_t.shape
    assert k == latent_dim, "weight_t must be (latent_dim, 2*output_dim)"
    output_dim = two_d // 2
    assert eps.shape == (*lead, output_dim)

    m = math.prod(lead)
    x2 = latent_output.reshape(m, latent_dim)
    eps2 = eps.reshape(m, output_dim)

    if row_tile is None:
        row_tile = m if m <= 256 else 256
    row_tile = max(1, min(row_tile, m))
    grid_m = pl.cdiv(m, row_tile)

    out2 = pl.pallas_call(
        _decode_kernel,
        out_shape=jax.ShapeDtypeStruct((m, output_dim), out_dtype),
        grid=(grid_m,),
        in_specs=[
            pl.BlockSpec((row_tile, latent_dim), lambda i: (i, 0)),
            # Constant index_map -> weight DMA'd once, VMEM-resident across steps.
            pl.BlockSpec((latent_dim, two_d), lambda i: (0, 0)),
            pl.BlockSpec((row_tile, output_dim), lambda i: (i, 0)),
        ],
        out_specs=pl.BlockSpec((row_tile, output_dim), lambda i: (i, 0)),
        # Row axis is independent work -> shard across v7x's 2 TensorCores.
        compiler_params=pltpu.CompilerParams(dimension_semantics=("parallel",)),
    )(x2, weight_t, eps2)

    return out2.reshape(*lead, output_dim)


if __name__ == "__main__":
    # Small shapes consistent with the module: n_way classes, latent_dim -> 2*output_dim.
    n_way, latent_dim, output_dim = 4, 32, 16

    key = jax.random.PRNGKey(0)
    k_w, k_x1, k_e1, k_x2, k_e2 = jax.random.split(key, 5)

    # nn.Linear stores (2*output_dim, latent_dim); re-layout ONCE to (latent_dim, 2*output_dim).
    bound = 1.0 / math.sqrt(latent_dim)
    weight = jax.random.uniform(
        k_w, (2 * output_dim, latent_dim), jnp.float32, minval=-bound, maxval=bound
    )
    weight_t = jnp.asarray(weight.T)  # one-time parameter re-layout (K, 2N)

    def reference(latent, w_t, eps):
        decoded = jnp.dot(latent, w_t, preferred_element_type=jnp.float32)
        means = decoded[..., :output_dim]
        stds = jnp.logaddexp(0.0, decoded[..., output_dim:])
        return eps.astype(jnp.float32) * stds + means

    # --- 1) single task, f32 (exactly the PyTorch module's forward shapes) ---
    latent1 = jax.random.normal(k_x1, (n_way, latent_dim), jnp.float32)
    eps1 = jax.random.normal(k_e1, (n_way, output_dim), jnp.float32)
    out1 = jax.block_until_ready(decoding_network_forward(latent1, weight_t, eps1))
    ref1 = reference(latent1, weight_t, eps1)
    assert out1.shape == (n_way, output_dim)
    assert out1.dtype == jnp.float32
    assert jnp.allclose(out1, ref1, atol=1e-5, rtol=1e-5)

    # --- 2) batched tasks, bf16 operands (f32 accumulation), grid over rows,
    #        weight VMEM-resident across grid steps ---
    tasks = 16
    latent2 = jax.random.normal(
        k_x2, (tasks, n_way, latent_dim), jnp.float32).astype(jnp.bfloat16)
    eps2 = jax.random.normal(k_e2, (tasks, n_way, output_dim), jnp.float32)
    w_bf16 = weight_t.astype(jnp.bfloat16)
    out2 = jax.block_until_ready(
        decoding_network_forward(latent2, w_bf16, eps2, row_tile=16))
    ref2 = reference(latent2, w_bf16, eps2)
    assert out2.shape == (tasks, n_way, output_dim)
    assert jnp.allclose(out2, ref2, atol=1e-3, rtol=1e-3)

    print("KERNEL_OK")
</pallas_src>

<mosaic_0001>
module attributes {stable_mosaic.version = 11 : i64} {
  func.func @_decode_kernel(%arg0: i32, %arg1: memref<4x32xf32, #tpu.memory_space<vmem>>, %arg2: memref<32x32xf32, #tpu.memory_space<vmem>>, %arg3: memref<4x16xf32, #tpu.memory_space<vmem>>, %arg4: memref<4x16xf32, #tpu.memory_space<vmem>>) attributes {dimension_semantics = [#tpu.dimension_semantics<parallel>], iteration_bounds = array<i64: 1>, scalar_prefetch = 0 : i64, scratch_operands = 0 : i64, tpu.core_type = #tpu.core_type<tc>, window_params = [{transform_indices = @transform_0, window_bounds = array<i64: 4, 32>}, {pipeline_mode = #tpu.pipeline_mode<synchronous>, transform_indices = @transform_1, window_bounds = array<i64: 32, 32>}, {transform_indices = @transform_2, window_bounds = array<i64: 4, 16>}, {transform_indices = @transform_3, window_bounds = array<i64: 4, 16>}]} {
    %c0 = arith.constant 0 : index
    %c0_0 = arith.constant 0 : index
    %0 = vector.load %arg1[%c0, %c0_0] : memref<4x32xf32, #tpu.memory_space<vmem>>, vector<4x32xf32>
    %c0_1 = arith.constant 0 : index
    %c0_2 = arith.constant 0 : index
    %1 = vector.load %arg2[%c0_1, %c0_2] : memref<32x32xf32, #tpu.memory_space<vmem>>, vector<32x16xf32>
    %cst = arith.constant dense<0.000000e+00> : vector<4x16xf32>
    %2 = tpu.matmul %0, %1, %cst {dimension_numbers = #tpu.dot_dimension_numbers<[1], [0], [0], [1], [0, 0, 1, 1], [], []>} : vector<4x32xf32>, vector<32x16xf32>, vector<4x16xf32> -> vector<4x16xf32>
    %c0_3 = arith.constant 0 : index
    %c16 = arith.constant 16 : index
    %3 = vector.load %arg2[%c0_3, %c16] : memref<32x32xf32, #tpu.memory_space<vmem>>, vector<32x16xf32>
    %cst_4 = arith.constant dense<0.000000e+00> : vector<4x16xf32>
    %4 = tpu.matmul %0, %3, %cst_4 {dimension_numbers = #tpu.dot_dimension_numbers<[1], [0], [0], [1], [0, 0, 1, 1], [], []>} : vector<4x32xf32>, vector<32x16xf32>, vector<4x16xf32> -> vector<4x16xf32>
    %cst_5 = arith.constant 0.000000e+00 : f32
    %5 = vector.broadcast %cst_5 : f32 to vector<4x16xf32>
    %6 = arith.maximumf %4, %5 : vector<4x16xf32>
    %7 = math.absf %4 : vector<4x16xf32>
    %cst_6 = arith.constant 0.000000e+00 : f32
    %8 = vector.broadcast %cst_6 : f32 to vector<4x16xf32>
    %9 = arith.subf %8, %7 : vector<4x16xf32>
    %10 = math.exp %9 : vector<4x16xf32>
    %11 = math.log1p %10 : vector<4x16xf32>
    %12 = arith.addf %6, %11 : vector<4x16xf32>
    %c0_7 = arith.constant 0 : index
    %c0_8 = arith.constant 0 : index
    %13 = vector.load %arg3[%c0_7, %c0_8] : memref<4x16xf32, #tpu.memory_space<vmem>>, vector<4x16xf32>
    %14 = arith.mulf %13, %12 : vector<4x16xf32>
    %15 = arith.addf %14, %2 : vector<4x16xf32>
    %c0_9 = arith.constant 0 : index
    %c0_10 = arith.constant 0 : index
    %16 = vector.load %arg4[%c0_9, %c0_10] : memref<4x16xf32, #tpu.memory_space<vmem>>, vector<4x16xf32>
    tpu.vector_store %arg4[%c0_9, %c0_10], %15 {strides = array<i32>} : memref<4x16xf32, #tpu.memory_space<vmem>>, vector<4x16xf32>,
    return
  }
  func.func @transform_0(%arg0: i32) -> (i32, i32) {
    %c0_i32 = arith.constant 0 : i32
    %c0_i32_0 = arith.constant 0 : i32
    return %arg0, %c0_i32 : i32, i32
  }
  func.func @transform_1(%arg0: i32) -> (i32, i32) {
    %c0_i32 = arith.constant 0 : i32
    %c0_i32_0 = arith.constant 0 : i32
    %c0_i32_1 = arith.constant 0 : i32
    return %c0_i32, %c0_i32_0 : i32, i32
  }
  func.func @transform_2(%arg0: i32) -> (i32, i32) {
    %c0_i32 = arith.constant 0 : i32
    %c0_i32_0 = arith.constant 0 : i32
    return %arg0, %c0_i32 : i32, i32
  }
  func.func @transform_3(%arg0: i32) -> (i32, i32) {
    %c0_i32 = arith.constant 0 : i32
    %c0_i32_0 = arith.constant 0 : i32
    return %arg0, %c0_i32 : i32, i32
  }
}

</mosaic_0001>

<bundles_post_ra>
// kernel: tpu_custom_call.1
= control target key start
LH: loop header
LB: loop body
LE: loop exit
PB: predicated region body
PF: predicated region fallthrough
CT: control target
= control target key end

     0   :  { %8 = vsyncpa [#allocation3], 0  ;;  %s458_s0 = inlined_call_operand.hbm [shape: f32[4,32], index: 0, kind: input, shape index: {}]   ;;  %s459_s1 = inlined_call_operand.hbm [shape: f32[32,32], index: 1, kind: input, shape index: {}]   ;;  %s460_s2 = inlined_call_operand.vmem [shape: f32[4,16], index: 2, kind: input, shape index: {}]   ;;  %s461_s3 = inlined_call_operand.hbm [shape: f32[4,16], index: 3, kind: output, shape index: {}]  }
   0x1   :  { %9 = vsyncpa [#allocation6], 0 }
   0x2   :  { %10 = vsyncpa [#allocation4], 0  ;;  %s383_s12 = smov [#allocation2]   ;;  %s384_s14 = smov [#allocation5]  }
   0x3   :  { %s17_s13 = sshll.u32 %s383_s12, 4  ;;  %s26_s15 = sshll.u32 %s384_s14, 4  ;;  %s18_s13 = int_to_ptr.vmem [resolvable:$true] %s17_s13  ;;  %s412_s15 = int_to_ptr.vmem [resolvable:$true] %s26_s15 }
   0x4   :  { %s311_s18 = scalar_lea.hbm %s458_s0, 64 }
   0x5   :  { %p312_p0 = scmp.ne.s32.totalorder %s458_s0, %s311_s18  ;;  %p315_p1 = scmp.lt.u32.totalorder %s311_s18, %s458_s0 }
   0x7   :  { %p317_p2 = pnand %p315_p1, %p312_p0 }
   0x9   :  { %320 = shalt.err (!%p317_p2)
}
   0xa   :  { %s321_s23 = scalar_lea.vmem %s18_s13, 64  ;;  %p326_p4 = scmp.lt.s32.totalorder %s18_s13, %s18_s13 }
   0xb   :  { %p322_p3 = scmp.ne.s32.totalorder %s18_s13, %s321_s23  ;;  %p327_p5 = scmp.lt.s32.totalorder %s321_s23, %s321_s23 }
   0xd   :  { %p328_p6 = por %p327_p5, %p326_p4 }
   0xf   :  { %p329_p7 = pnand %p328_p6, %p322_p3 }
  0x11   :  { %332 = shalt.err (!%p329_p7)
}
  0x12   :  { %20 = dma.hbm_to_vmem [thread:$0]  %s458_s0, 64, %s18_s13, [#allocation3]  }
  0x13   :  { %s333_s28 = scalar_lea.hbm %s459_s1, 512 }
  0x14   :  { %p334_p8 = scmp.ne.s32.totalorder %s459_s1, %s333_s28  ;;  %p337_p9 = scmp.lt.u32.totalorder %s333_s28, %s459_s1 }
  0x16   :  { %p339_p10 = pnand %p337_p9, %p334_p8 }
  0x18   :  { %342 = shalt.err (!%p339_p10)
}
  0x19   :  { %s343_s6 = scalar_lea.vmem %s412_s15, 512  ;;  %p348_p12 = scmp.lt.s32.totalorder %s412_s15, %s412_s15 }
  0x1a   :  { %p344_p11 = scmp.ne.s32.totalorder %s412_s15, %s343_s6  ;;  %p349_p13 = scmp.lt.s32.totalorder %s343_s6, %s343_s6 }
  0x1c   :  { %p350_p0 = por %p349_p13, %p348_p12 }
  0x1e   :  { %p351_p1 = pnand %p350_p0, %p344_p11 }
  0x20   :  { %354 = shalt.err (!%p351_p1)
}
  0x21   :  { %s385_s0 = smov 128   ;;  %s386_s7 = smov 8  }
  0x22   :  { %32 = dma.hbm_to_vmem [thread:$0]  %s459_s1, 512, %s412_s15, [#allocation6], %s385_s0, %s385_s0, %s386_s7  }
  0x23   :  { %377 = dma.done.wait [#allocation3], 64  }
  0x24   :  { %378 = vsyncadd [#allocation3], 4294967232 }
  0x25   :  { %379 = dma.done.wait [#allocation6], 512  }
  0x26   :  { %380 = vsyncadd [#allocation6], 4294966784  ;;  %v387_v0 = vmov 0.0|0.0   ;;  %vm388_vm0 = vmmov 0   ;;  %v389_v1 = vmov 0.0   ;;  %v42_v2 = vld [vmem:[#allocation5] sm:$0xff] }
  0x27   :  { %282 = vmatprep.subr.bf16.mxu1 %v387_v0  ;;  %276 = vmatprep.subr.bf16.mxu0 %v387_v0  ;;  %v43_v3 = vld [vmem:[#allocation5 + $0x8] sm:$0xff]  ;;  %v44_v4 = vld [vmem:[#allocation5 + $0x10] sm:$0xff]  ;;  %v45_v6 = vld [vmem:[#allocation5 + $0x18] sm:$0xff]  ;;  %s390_s10 = smov 112   ;;  %vm46_vm1 = vcmask 261120   ;;  %s391_s12 = smov [#allocation7]  }
  0x28   :  { %273 = vmatprep.mubr.msk.f32.mxu1 %vm388_vm0, %v389_v1  ;;  %262 = vmatprep.mubr.msk.f32.mxu0 %vm388_vm0, %v389_v1  ;;  %v297_v5 = vpack.i.bf16 %v43_v3, %v42_v2  ;;  %v277_v7 = vpack.c.bf16 %v43_v3, %v42_v2  ;;  %v302_v8 = vpack.i.bf16 %v45_v6, %v44_v4  ;;  %v41_v10 = vld [vmem:[#allocation2] sm:$0xf]  ;;  %s232_s13 = sshll.u32 %s391_s12, 4  ;;  %vm224_vm3 = vcmask 125952   ;;  %s233_s13 = int_to_ptr.vmem [resolvable:$true] %s232_s13 }
  0x29   :  { %v280_v9 = vpack.c.bf16 %v45_v6, %v44_v4  ;;  %v221_v36 = vld [vmem:[%s460_s2] sm:$0xf]  ;;  %s355_s14 = scalar_lea.vmem %s233_s13, 64  ;;  %p360_p3 = scmp.lt.s32.totalorder %s233_s13, %s233_s13 }
  0x2a   :  { %298 = vrot.lane.b32.xlu0 %v297_v5, %s390_s10  ;;  %278 = vmatpush3.bf16.msra.mxu0 %v277_v7  ;;  %p356_p2 = scmp.ne.s32.totalorder %s233_s13, %s355_s14  ;;  %p361_p4 = scmp.lt.s32.totalorder %s355_s14, %s355_s14 }
  0x2b   :  { %279 = vmatprep.subr.bf16.mxu0 %v387_v0 }
  0x2c   :  { %p362_p5 = por %p361_p4, %p360_p3 }
  0x2e   :  { %303 = vrot.lane.b32.xlu0 %v302_v8, %s390_s10  ;;  %281 = vmatpush3.bf16.msra.mxu0 %v280_v9  ;;  %p363_p6 = pnand %p362_p5, %p356_p2 }
  0x31   :  { %263 = vmatmul.mubr.msk.f32.vlgmr.msra.gmra.mrb[0].mxu0 %vm46_vm1, %v41_v10 }
  0x9c   :  { %v299_v11 = vpop.permute.xlu0 %298 }
  0x9d   :  { %v301_v12 = vunpack.i.h.bf16 %v299_v11  ;;  %v300_v13 = vunpack.i.l.bf16 %v299_v11 }
  0x9f   :  { %v283_v14 = vpack.c.bf16 %v301_v12, %v300_v13 }
  0xa0   :  { %v304_v15 = vpop.permute.xlu0 %303 }
  0xa1   :  { %v306_v16 = vunpack.i.h.bf16 %v304_v15  ;;  %v305_v17 = vunpack.i.l.bf16 %v304_v15  ;;  %284 = vmatpush3.bf16.msra.mxu1 %v283_v14 }
  0xa2   :  { %285 = vmatprep.subr.bf16.mxu1 %v387_v0 }
  0xa3   :  { %v286_v18 = vpack.c.bf16 %v306_v16, %v305_v17 }
  0xa5   :  { %287 = vmatpush3.bf16.msra.mxu1 %v286_v18 }
  0xa8   :  { %274 = vmatmul.mubr.msk.f32.vlgmr.msra.gmra.mrb[0].mxu1 %vm46_vm1, %v41_v10 }
 0x104   :  { %v116_v19 = vpop.f32.mrb[0].mxu0 }
 0x105   :  { %v264_v20 = vpop.f32.mrb[1].mxu0 }
 0x17b   :  { %v202_v21 = vpop.f32.mrb[0].mxu1 }
 0x17c   :  { %v207_v22 = vand.u32 2147483647, %v202_v21  ;;  %v275_v23 = vpop.f32.mrb[1].mxu1  ;;  %v206_v34 = vmax.f32 %v202_v21, 0.0 }
 0x17e   :  { %v208_v24 = vsub.f32 0.0, %v207_v22 }
 0x180   :  { %v209_v25 = vmul.f32 1.442695, %v208_v24 }
 0x182   :  { %307 = vpow2.f32 %v209_v25 }
 0x18c   :  { %v308_v26 = vpop.eup %307 }
 0x18d   :  { %v211_v27 = vadd.f32 1.0, %v308_v26  ;;  %v214_v28 = vmul.f32 -0.5, %v308_v26  ;;  %v217_v30 = vand.u32 2147483647, %v308_v26 }
 0x18f   :  { %309 = vlog2.f32 %v211_v27  ;;  %v215_v29 = vadd.f32 1.0, %v214_v28  ;;  %vm218_vm2 = vcmp.lt.f32.partialorder %v217_v30, 0.0004427343 }
 0x191   :  { %v216_v33 = vmul.f32 %v308_v26, %v215_v29 }
 0x199   :  { %v310_v31 = vpop.eup %309 }
 0x19a   :  { %v213_v32 = vmul.f32 0.6931472, %v310_v31 }
 0x19c   :  { %v219_v35 = vsel %vm218_vm2, %v216_v33, %v213_v32 }
 0x19d   :  { %v220_v37 = vadd.f32 %v219_v35, %v206_v34 }
 0x19f   :  { %v222_v38 = vmul.f32 %v221_v36, %v220_v37 }
 0x1a1   :  { %v223_v39 = vadd.f32 %v222_v38, %v116_v19 }
 0x1a3   :  { %225 = vst.msk [vmem:[#allocation7] sm:$0xf] %vm224_vm3, %v223_v39 }
 0x1a4   :  { %366 = shalt.err (!%p363_p6)
}
 0x1a5   :  { %s367_s17 = scalar_lea.hbm %s461_s3, 64 }
 0x1a6   :  { %p368_p7 = scmp.ne.s32.totalorder %s461_s3, %s367_s17  ;;  %p371_p8 = scmp.lt.u32.totalorder %s367_s17, %s461_s3 }
 0x1a8   :  { %p373_p9 = pnand %p371_p8, %p368_p7 }
 0x1aa   :  { %376 = shalt.err (!%p373_p9)
}
 0x1ab   :  { %235 = dma.vmem_to_hbm [thread:$0]  %s233_s13, 64, %s461_s3, [#allocation4]  }
 0x1ac   :  { %381 = dma.done.wait [#allocation4], 64  }
 0x1ad   :  { %382 = vsyncadd [#allocation4], 4294967232 }
 0x1ae   :  { %239 = vsyncpa [#allocation3], 1 }
 0x1af   :  { %240 = vsyncpa [#allocation6], 1 }
 0x1b0   :  { %241 = vsyncpa [#allocation4], 1 }

</bundles_post_ra>
